<compile_context>
chip_gen: v6e
topology: v6e:2x2x1
jax: 0.10.0
libtpu: 0.0.40
codegen_flags: <defaults>
</compile_context>

<pallas_src>
import functools

import jax
import jax.numpy as jnp
from jax.experimental import pallas as pl
from jax.experimental.pallas import tpu as pltpu


def _round_up(n: int, m: int) -> int:
    return ((n + m - 1) // m) * m


def _pad2(a, rows: int, cols: int, dtype=None):
    if dtype is not None:
        a = a.astype(dtype)
    return jnp.pad(a, ((0, rows - a.shape[0]), (0, cols - a.shape[1])))


def actor_kernel(x_ref, wp_ref, bp_ref, w1_ref, b1_ref, w2_ref, b2_ref, o_ref):
    # --- policy network stand-in (feature extractor): Linear + ReLU ---
    # x and wp are already bf16; accumulate in f32 on the MXU.
    h = jnp.dot(x_ref[...], wp_ref[...], preferred_element_type=jnp.float32)
    h = jnp.maximum(h + bp_ref[...], 0.0)

    # --- head layer 1: Linear(input_layer_size, feature_size) + ReLU ---
    h = jnp.dot(h.astype(jnp.bfloat16), w1_ref[...],
                preferred_element_type=jnp.float32)
    h = jnp.maximum(h + b1_ref[...], 0.0)

    # --- head layer 2: Linear(feature_size, action_size) + Tanh ---
    a = jnp.dot(h.astype(jnp.bfloat16), w2_ref[...],
                preferred_element_type=jnp.float32)
    o_ref[...] = jnp.tanh(a + b2_ref[...]).astype(o_ref.dtype)


def prepare_params(params):
    """One-time padding / bf16 casting of parameters (do this at init, not per call)."""
    wp, bp, w1, b1, w2, b2 = params
    S, L = wp.shape
    F = w1.shape[1]
    A = w2.shape[1]
    L_p, F_p, A_p = (_round_up(d, 128) for d in (L, F, A))
    prepped = (
        _pad2(wp, S, L_p, jnp.bfloat16),           # (S,   L_p) bf16  (S unpadded)
        _pad2(bp.reshape(1, -1), 1, L_p),          # (1,   L_p) f32
        _pad2(w1, L_p, F_p, jnp.bfloat16),         # (L_p, F_p) bf16
        _pad2(b1.reshape(1, -1), 1, F_p),          # (1,   F_p) f32
        _pad2(w2, F_p, A_p, jnp.bfloat16),         # (F_p, A_p) bf16
        _pad2(b2.reshape(1, -1), 1, A_p),          # (1,   A_p) f32
    )
    return prepped, A


@functools.partial(jax.jit, static_argnames=("action_size", "tile_b_max"))
def actor_forward(x, prepped_params, *, action_size: int, tile_b_max: int = 2048):
    """x: [B, state_dim] float32 -> action values: [B, action_size] float32."""
    wp_p, bp_p, w1_p, b1_p, w2_p, b2_p = prepped_params
    B, S = x.shape
    L_p = wp_p.shape[1]
    F_p = w1_p.shape[1]
    A_p = w2_p.shape[1]
    A = action_size

    # Batch tile: 16-aligned (bf16 sublane packing), rounded AFTER the min so an
    # unaligned tile_b_max can never produce an illegal block.
    tile_b = _round_up(min(tile_b_max, B), 16)
    # v7x has 2 TensorCores: make sure the "parallel" batch axis has >= 2 grid
    # steps when the batch is big enough (harmless extra step on v5e/v6e).
    if B >= 32 and pl.cdiv(B, tile_b) < 2:
        tile_b = _round_up(pl.cdiv(B, 2), 16)
    grid_b = pl.cdiv(B, tile_b)
    B_p = grid_b * tile_b

    # Stream x as bf16, unpadded in the feature dim (S == full array dim is a
    # legal block shape); only pad the batch dim if the grid overshoots.
    x_bf = x.astype(jnp.bfloat16)
    if B_p != B:
        x_bf = jnp.pad(x_bf, ((0, B_p - B), (0, 0)))

    full = lambda shape: pl.BlockSpec(shape, lambda i: (0, 0))

    out_p = pl.pallas_call(
        actor_kernel,
        out_shape=jax.ShapeDtypeStruct((B_p, A_p), jnp.bfloat16),
        grid=(grid_b,),
        in_specs=[
            pl.BlockSpec((tile_b, S), lambda i: (i, 0)),     # x tile (pipelined, bf16)
            full((S, L_p)), full((1, L_p)),                  # policy-net weights
            full((L_p, F_p)), full((1, F_p)),                # head layer 1
            full((F_p, A_p)), full((1, A_p)),                # head layer 2
        ],
        out_specs=pl.BlockSpec((tile_b, A_p), lambda i: (i, 0)),  # lane-dense bf16 slab
        compiler_params=pltpu.CompilerParams(
            dimension_semantics=("parallel",)),              # v7x: 2 TCs share batch
    )(x_bf, wp_p, bp_p, w1_p, b1_p, w2_p, b2_p)

    return out_p[:B, :A].astype(jnp.float32)


def init_params(key, state_dim, input_layer_size, feature_size, action_size):
    """Deterministic synthetic parameters (PyTorch-Linear-like uniform init)."""
    ks = jax.random.split(key, 6)

    def lin(kw, kb, fan_in, fan_out):
        bound = 1.0 / jnp.sqrt(fan_in)
        w = jax.random.uniform(kw, (fan_in, fan_out), jnp.float32, -bound, bound)
        b = jax.random.uniform(kb, (1, fan_out), jnp.float32, -bound, bound)
        return w, b

    wp, bp = lin(ks[0], ks[1], state_dim, input_layer_size)       # policy net
    w1, b1 = lin(ks[2], ks[3], input_layer_size, feature_size)    # head layer 1
    w2, b2 = lin(ks[4], ks[5], feature_size, action_size)         # head layer 2
    return wp, bp, w1, b1, w2, b2


def actor_reference(x, params):
    """Pure-JAX f32 reference for correctness check."""
    wp, bp, w1, b1, w2, b2 = params
    h = jnp.maximum(x @ wp + bp, 0.0)
    h = jnp.maximum(h @ w1 + b1, 0.0)
    return jnp.tanh(h @ w2 + b2)


if __name__ == "__main__":
    B = 32                     # batch of state features (kept small for the demo)
    state_dim = 24             # raw state feature size fed to policy_network
    input_layer_size = 24      # == policy_network.last_layer_size
    feature_size = 48          # hidden width of the action head
    action_size = 6            # number of discrete actions
    # lr is an optimizer hyperparameter; LogSoftmax/Categorical live in .policy(),
    # not in forward(), so they are out of scope here.

    key = jax.random.PRNGKey(0)
    kx, kp = jax.random.split(key)
    x = jax.random.normal(kx, (B, state_dim), dtype=jnp.float32)
    params = init_params(kp, state_dim, input_layer_size, feature_size, action_size)

    prepped, A = prepare_params(params)          # one-time pad + bf16 cast
    out = jax.block_until_ready(
        actor_forward(x, prepped, action_size=A))
    ref = actor_reference(x, params)

    assert out.shape == (B, action_size)
    # bf16 MXU inputs / bf16 output slab with f32 accumulation; tanh in [-1, 1].
    assert jnp.allclose(out, ref, atol=2e-2, rtol=2e-2), "mismatch vs reference"

    print("KERNEL_OK")
</pallas_src>

<mosaic_0001>
module attributes {stable_mosaic.version = 11 : i64} {
  func.func @actor_kernel(%arg0: i32, %arg1: memref<16x24xbf16, #tpu.memory_space<vmem>>, %arg2: memref<24x128xbf16, #tpu.memory_space<vmem>>, %arg3: memref<1x128xf32, #tpu.memory_space<vmem>>, %arg4: memref<128x128xbf16, #tpu.memory_space<vmem>>, %arg5: memref<1x128xf32, #tpu.memory_space<vmem>>, %arg6: memref<128x128xbf16, #tpu.memory_space<vmem>>, %arg7: memref<1x128xf32, #tpu.memory_space<vmem>>, %arg8: memref<16x128xbf16, #tpu.memory_space<vmem>>) attributes {dimension_semantics = [#tpu.dimension_semantics<parallel>], iteration_bounds = array<i64: 2>, scalar_prefetch = 0 : i64, scratch_operands = 0 : i64, tpu.core_type = #tpu.core_type<tc>, window_params = [{transform_indices = @transform_0, window_bounds = array<i64: 16, 24>}, {pipeline_mode = #tpu.pipeline_mode<synchronous>, transform_indices = @transform_1, window_bounds = array<i64: 24, 128>}, {pipeline_mode = #tpu.pipeline_mode<synchronous>, transform_indices = @transform_2, window_bounds = array<i64: 1, 128>}, {pipeline_mode = #tpu.pipeline_mode<synchronous>, transform_indices = @transform_3, window_bounds = array<i64: 128, 128>}, {pipeline_mode = #tpu.pipeline_mode<synchronous>, transform_indices = @transform_4, window_bounds = array<i64: 1, 128>}, {pipeline_mode = #tpu.pipeline_mode<synchronous>, transform_indices = @transform_5, window_bounds = array<i64: 128, 128>}, {pipeline_mode = #tpu.pipeline_mode<synchronous>, transform_indices = @transform_6, window_bounds = array<i64: 1, 128>}, {transform_indices = @transform_7, window_bounds = array<i64: 16, 128>}]} {
    %c0 = arith.constant 0 : index
    %c0_0 = arith.constant 0 : index
    %0 = vector.load %arg1[%c0, %c0_0] : memref<16x24xbf16, #tpu.memory_space<vmem>>, vector<16x24xbf16>
    %c0_1 = arith.constant 0 : index
    %c0_2 = arith.constant 0 : index
    %1 = vector.load %arg2[%c0_1, %c0_2] : memref<24x128xbf16, #tpu.memory_space<vmem>>, vector<24x128xbf16>
    %cst = arith.constant dense<0.000000e+00> : vector<16x128xf32>
    %2 = tpu.matmul %0, %1, %cst {dimension_numbers = #tpu.dot_dimension_numbers<[1], [0], [0], [1], [0, 0, 1, 1], [], []>} : vector<16x24xbf16>, vector<24x128xbf16>, vector<16x128xf32> -> vector<16x128xf32>
    %c0_3 = arith.constant 0 : index
    %c0_4 = arith.constant 0 : index
    %3 = vector.load %arg3[%c0_3, %c0_4] : memref<1x128xf32, #tpu.memory_space<vmem>>, vector<1x128xf32>
    %4 = vector.broadcast %3 : vector<1x128xf32> to vector<16x128xf32>
    %5 = arith.addf %2, %4 : vector<16x128xf32>
    %cst_5 = arith.constant 0.000000e+00 : f32
    %6 = vector.broadcast %cst_5 : f32 to vector<16x128xf32>
    %7 = arith.maximumf %5, %6 : vector<16x128xf32>
    %8 = arith.truncf %7 : vector<16x128xf32> to vector<16x128xbf16>
    %c0_6 = arith.constant 0 : index
    %c0_7 = arith.constant 0 : index
    %9 = vector.load %arg4[%c0_6, %c0_7] : memref<128x128xbf16, #tpu.memory_space<vmem>>, vector<128x128xbf16>
    %cst_8 = arith.constant dense<0.000000e+00> : vector<16x128xf32>
    %10 = tpu.matmul %8, %9, %cst_8 {dimension_numbers = #tpu.dot_dimension_numbers<[1], [0], [0], [1], [0, 0, 1, 1], [], []>} : vector<16x128xbf16>, vector<128x128xbf16>, vector<16x128xf32> -> vector<16x128xf32>
    %c0_9 = arith.constant 0 : index
    %c0_10 = arith.constant 0 : index
    %11 = vector.load %arg5[%c0_9, %c0_10] : memref<1x128xf32, #tpu.memory_space<vmem>>, vector<1x128xf32>
    %12 = vector.broadcast %11 : vector<1x128xf32> to vector<16x128xf32>
    %13 = arith.addf %10, %12 : vector<16x128xf32>
    %cst_11 = arith.constant 0.000000e+00 : f32
    %14 = vector.broadcast %cst_11 : f32 to vector<16x128xf32>
    %15 = arith.maximumf %13, %14 : vector<16x128xf32>
    %16 = arith.truncf %15 : vector<16x128xf32> to vector<16x128xbf16>
    %c0_12 = arith.constant 0 : index
    %c0_13 = arith.constant 0 : index
    %17 = vector.load %arg6[%c0_12, %c0_13] : memref<128x128xbf16, #tpu.memory_space<vmem>>, vector<128x128xbf16>
    %cst_14 = arith.constant dense<0.000000e+00> : vector<16x128xf32>
    %18 = tpu.matmul %16, %17, %cst_14 {dimension_numbers = #tpu.dot_dimension_numbers<[1], [0], [0], [1], [0, 0, 1, 1], [], []>} : vector<16x128xbf16>, vector<128x128xbf16>, vector<16x128xf32> -> vector<16x128xf32>
    %c0_15 = arith.constant 0 : index
    %c0_16 = arith.constant 0 : index
    %19 = vector.load %arg7[%c0_15, %c0_16] : memref<1x128xf32, #tpu.memory_space<vmem>>, vector<1x128xf32>
    %20 = vector.broadcast %19 : vector<1x128xf32> to vector<16x128xf32>
    %21 = arith.addf %18, %20 : vector<16x128xf32>
    %22 = math.tanh %21 : vector<16x128xf32>
    %23 = arith.truncf %22 : vector<16x128xf32> to vector<16x128xbf16>
    %c0_17 = arith.constant 0 : index
    %c0_18 = arith.constant 0 : index
    %24 = vector.load %arg8[%c0_17, %c0_18] : memref<16x128xbf16, #tpu.memory_space<vmem>>, vector<16x128xbf16>
    tpu.vector_store %arg8[%c0_17, %c0_18], %23 {strides = array<i32>} : memref<16x128xbf16, #tpu.memory_space<vmem>>, vector<16x128xbf16>,
    return
  }
  func.func @transform_0(%arg0: i32) -> (i32, i32) {
    %c0_i32 = arith.constant 0 : i32
    %c0_i32_0 = arith.constant 0 : i32
    return %arg0, %c0_i32 : i32, i32
  }
  func.func @transform_1(%arg0: i32) -> (i32, i32) {
    %c0_i32 = arith.constant 0 : i32
    %c0_i32_0 = arith.constant 0 : i32
    %c0_i32_1 = arith.constant 0 : i32
    return %c0_i32, %c0_i32_0 : i32, i32
  }
  func.func @transform_2(%arg0: i32) -> (i32, i32) {
    %c0_i32 = arith.constant 0 : i32
    %c0_i32_0 = arith.constant 0 : i32
    %c0_i32_1 = arith.constant 0 : i32
    return %c0_i32, %c0_i32_0 : i32, i32
  }
  func.func @transform_3(%arg0: i32) -> (i32, i32) {
    %c0_i32 = arith.constant 0 : i32
    %c0_i32_0 = arith.constant 0 : i32
    %c0_i32_1 = arith.constant 0 : i32
    return %c0_i32, %c0_i32_0 : i32, i32
  }
  func.func @transform_4(%arg0: i32) -> (i32, i32) {
    %c0_i32 = arith.constant 0 : i32
    %c0_i32_0 = arith.constant 0 : i32
    %c0_i32_1 = arith.constant 0 : i32
    return %c0_i32, %c0_i32_0 : i32, i32
  }
  func.func @transform_5(%arg0: i32) -> (i32, i32) {
    %c0_i32 = arith.constant 0 : i32
    %c0_i32_0 = arith.constant 0 : i32
    %c0_i32_1 = arith.constant 0 : i32
    return %c0_i32, %c0_i32_0 : i32, i32
  }
  func.func @transform_6(%arg0: i32) -> (i32, i32) {
    %c0_i32 = arith.constant 0 : i32
    %c0_i32_0 = arith.constant 0 : i32
    %c0_i32_1 = arith.constant 0 : i32
    return %c0_i32, %c0_i32_0 : i32, i32
  }
  func.func @transform_7(%arg0: i32) -> (i32, i32) {
    %c0_i32 = arith.constant 0 : i32
    %c0_i32_0 = arith.constant 0 : i32
    return %arg0, %c0_i32 : i32, i32
  }
}

</mosaic_0001>

<bundles_post_ra>
// kernel: actor_forward.1
= control target key start
LH: loop header
LB: loop body
LE: loop exit
PB: predicated region body
PF: predicated region fallthrough
CT: control target
= control target key end

     0   :  { %12 = vsyncpa [#allocation3], 0  ;;  %s1123_s0 = inlined_call_operand.vmem [shape: bf16[32,24], index: 0, kind: input, shape index: {}]   ;;  %s1124_s1 = inlined_call_operand.hbm [shape: bf16[24,128], index: 1, kind: input, shape index: {}]   ;;  %s1125_s2 = inlined_call_operand.vmem [shape: f32[1,128], index: 2, kind: input, shape index: {}]   ;;  %s1126_s3 = inlined_call_operand.vmem [shape: bf16[128,128], index: 3, kind: input, shape index: {}]   ;;  %s1127_s4 = inlined_call_operand.vmem [shape: f32[1,128], index: 4, kind: input, shape index: {}]   ;;  %s1128_s5 = inlined_call_operand.hbm [shape: bf16[128,128], index: 5, kind: input, shape index: {}]   ;;  %s1129_s6 = inlined_call_operand.vmem [shape: f32[1,128], index: 6, kind: input, shape index: {}]   ;;  %s1130_s7 = inlined_call_operand.vmem [shape: bf16[32,128], index: 7, kind: output, shape index: {}]  }
   0x1   :  { %13 = vsyncpa [#allocation5], 0  ;;  %s994_s24 = smov 0  }
   0x2 LB: > { %s708_s25 = sadd.s32 4294967295, %s946_s24   ;;  %p710_p0 = scmp.ge.s32.totalorder %s946_s24, 1  ;;  %s946_s24 = sphi %s994_s24, %s19_s24  }
   0x3   : > { %p202_p1 = scmp.lt.s32.totalorder %s946_s24, 3  ;;  %s948_s26 = smov [#allocation2]  }
   0x4   : > { %s214_s27 = sshll.u32 %s948_s26, 4  ;;  %p1008_p3 = scmp.eq.s32.totalorder %s708_s25, 0  ;;  %s215_s27 = int_to_ptr.vmem [resolvable:$true] %s214_s27 }
   0x5   : > { %p1002_p2 = pnand %p710_p0, %p202_p1  ;;  %s949_s30 = smov [#allocation4]  }
   0x6   : > { %s236_s8 = sshll.u32 %s949_s30, 4  ;;  %s891_s10 = scalar_lea.vmem %s215_s27, 192  ;;  %s237_s8 = int_to_ptr.vmem [resolvable:$true] %s236_s8 }
   0x7   : > { %p832_p4 = pneg %p1002_p2  ;;  %p892_p7 = scmp.ne.s32.totalorder %s215_s27, %s891_s10 }
   0x8   : > { %p899_p10 = scmp.lt.s32.totalorder %s215_s27, %s215_s27  ;;  %p900_p11 = scmp.lt.s32.totalorder %s891_s10, %s891_s10 }
   0x9   : > { %p1016_p5 = pnand %p1008_p3, %p832_p4 }
   0xa   : > { %p901_p12 = por %p900_p11, %p899_p10 }
   0xb   : > { %p882_p6 = pneg %p1016_p5 }
   0xd   : > { %p894_p8 = pnand %p892_p7, %p882_p6 }
   0xf   : > { %p895_p9 = pneg %p894_p8 }
  0x11   : > { %p902_p13 = pnand %p901_p12, %p895_p9 }
  0x13   : > { %905 = shalt.err (!%p902_p13)
}
  0x14   : > { %s950_s11 = smov 64   ;;  %s951_s12 = smov 4  }
  0x15   : > { %835 = dma.hbm_to_vmem [thread:$0]  (!%p1016_p5), %s1124_s1, 192, %s215_s27, [#allocation3], %s950_s11, %s950_s11, %s951_s12  }
  0x16   : > { %s917_s15 = scalar_lea.vmem %s237_s8, 1024  ;;  %p925_p7 = scmp.lt.s32.totalorder %s237_s8, %s237_s8 }
  0x17   : > { %p918_p0 = scmp.ne.s32.totalorder %s237_s8, %s917_s15  ;;  %p926_p8 = scmp.lt.s32.totalorder %s917_s15, %s917_s15 }
  0x19   : > { %p920_p1 = pnand %p918_p0, %p882_p6  ;;  %p927_p10 = por %p926_p8, %p925_p7 }
  0x1b   : > { %p921_p4 = pneg %p920_p1 }
  0x1d   : > { %p928_p9 = pnand %p927_p10, %p921_p4 }
  0x1f   : > { %931 = shalt.err (!%p928_p9)
}
  0x20   : > { %838 = dma.hbm_to_vmem [thread:$0]  (!%p1016_p5), %s1128_s5, 1024, %s237_s8, [#allocation5], %s950_s11, %s950_s11, %s951_s12  }
  0x21   : > { %264 = sbr.rel (%p1002_p2) target bundleno = 673 (0x2a1), region = 48 }
  0x26   : > { %937 = dma.done.wait (%p1008_p3), [#allocation3], 192  }
  0x27   : > { %939 = vsyncadd (%p1008_p3), [#allocation3], 4294967104 }
  0x28   : > { %941 = dma.done.wait (%p1008_p3), [#allocation5], 1024  }
  0x29   : > { %943 = vsyncadd (%p1008_p3), [#allocation5], 4294966272  ;;  %s717_s18 = sshll.u32 %s708_s25, 1  ;;  %v952_v0 = vmov 0.0   ;;  %vm953_vm0 = vmmov 0   ;;  %vm343_vm1 = vcmask 1043456  }
  0x2a   : > { %776 = vmatprep.subr.bf16.mxu0 %v952_v0  ;;  %780 = vmatprep.mubr.msk.bf16.mxu0 %vm953_vm0, %v952_v0  ;;  %p301_p2 = scmp.lt.s32.totalorder %s717_s18, 3  ;;  %v857_v1 = vld [vmem:[#allocation2 + $0x8] ss:$0 sps:$4 sm:$0xff]   ;;  %v858_v3 = vld [vmem:[#allocation2] sm:$0xff]   ;;  %v860_v4 = vld [vmem:[%s1126_s3 + $0x38] sm:$0xff]   ;;  %vm339_vm2 = vcmask 195584  }
  0x2b   : > { %784 = vmatprep.subr.bf16.mxu1 %v952_v0  ;;  %800 = vmatprep.mubr.msk.bf16.mxu1 %vm953_vm0, %v952_v0  ;;  %v345_v2 = vsel %vm343_vm1, %v857_v1, 0  ;;  %v861_v5 = vld [vmem:[%s1126_s3 + $0x30] sm:$0xff]   ;;  %v862_v7 = vld [vmem:[%s1126_s3 + $0x28] sm:$0xff]   ;;  %v863_v8 = vld [vmem:[%s1126_s3 + $0x20] sm:$0xff]  }
  0x2c   : > { %s1135_s18 = smov (!%p301_p2, %s717_s18), 3  ;;  %777 = vmatpush3.bf16.msra.mxu0 %v345_v2  ;;  %785 = vmatpush3.bf16.msra.mxu1 %v860_v4  ;;  %v864_v9 = vld [vmem:[%s1126_s3 + $0x18] sm:$0xff]   ;;  %v865_v10 = vld [vmem:[%s1126_s3 + $0x10] sm:$0xff]   ;;  %v866_v11 = vld [vmem:[%s1126_s3 + $0x8] sm:$0xff]  }
  0x2d   : > { %s718_s19 = sshll.u32 %s1135_s18, 2  ;;  %778 = vmatprep.subr.bf16.mxu0 %v952_v0  ;;  %786 = vmatprep.subr.bf16.mxu1 %v952_v0  ;;  %v867_v12 = vld [vmem:[%s1126_s3] sm:$0xff]   ;;  %v870_v15 = vld [vmem:[#allocation4 + $0x28] sm:$0xff]   ;;  %v871_v16 = vld [vmem:[#allocation4 + $0x20] sm:$0xff]  }
  0x2e   : > { %s304_s22 = scalar_lea.vmem %s1123_s0, %s718_s19  ;;  %v868_v13 = vld [vmem:[#allocation4 + $0x38] sm:$0xff]   ;;  %v869_v14 = vld [vmem:[#allocation4 + $0x30] sm:$0xff]   ;;  %v874_v29 = vld [vmem:[#allocation4 + $0x8] sm:$0xff]   ;;  %s310_s28 = scalar_lea.vmem %s1130_s7, %s718_s19 }
  0x2f   : > { %v859_v6 = vld [vmem:[%s304_s22] sm:$0xff]   ;;  %v875_v30 = vld [vmem:[#allocation4] sm:$0xff]  }
  0x30   : > { %779 = vmatpush3.bf16.msra.mxu0 %v858_v3  ;;  %787 = vmatpush3.bf16.msra.mxu1 %v861_v5  ;;  %v872_v17 = vld [vmem:[#allocation4 + $0x18] sm:$0xff]   ;;  %v721_v18 = vld [vmem:[%s1125_s2] ss:$0 sm:$0xff] }
  0x31   : > { %804 = vmatprep.subr.bf16.mxu0 %v952_v0  ;;  %788 = vmatprep.subr.bf16.mxu1 %v952_v0  ;;  %v873_v28 = vld [vmem:[#allocation4 + $0x10] sm:$0xff]  }
  0x32   : > { %v726_v31 = vld [vmem:[%s1127_s4] ss:$0 sm:$0xff] }
  0x33   : > { %781 = vmatmul.mubr.msk.bf16.vlgmr.msra.gmra.mxu0 %vm339_vm2, %v859_v6  ;;  %v735_v41 = vld [vmem:[%s1129_s6] ss:$0 sm:$0xff] }
  0x34   : > { %820 = vmatprep.mubr.msk.bf16.mxu0 %vm953_vm0, %v952_v0  ;;  %789 = vmatpush3.bf16.msra.mxu1 %v862_v7 }
  0x35   : > { %790 = vmatprep.subr.bf16.mxu1 %v952_v0  ;;  %805 = vmatpush3.bf16.msra.mxu0 %v868_v13 }
  0x36   : > { %806 = vmatprep.subr.bf16.mxu0 %v952_v0 }
  0x38   : > { %791 = vmatpush3.bf16.msra.mxu1 %v863_v8 }
  0x39   : > { %792 = vmatprep.subr.bf16.mxu1 %v952_v0  ;;  %807 = vmatpush3.bf16.msra.mxu0 %v869_v14 }
  0x3a   : > { %808 = vmatprep.subr.bf16.mxu0 %v952_v0 }
  0x3c   : > { %793 = vmatpush3.bf16.msra.mxu1 %v864_v9 }
  0x3d   : > { %794 = vmatprep.subr.bf16.mxu1 %v952_v0  ;;  %809 = vmatpush3.bf16.msra.mxu0 %v870_v15 }
  0x3e   : > { %810 = vmatprep.subr.bf16.mxu0 %v952_v0 }
  0x40   : > { %795 = vmatpush3.bf16.msra.mxu1 %v865_v10 }
  0x41   : > { %796 = vmatprep.subr.bf16.mxu1 %v952_v0  ;;  %811 = vmatpush3.bf16.msra.mxu0 %v871_v16 }
  0x42   : > { %812 = vmatprep.subr.bf16.mxu0 %v952_v0 }
  0x44   : > { %797 = vmatpush3.bf16.msra.mxu1 %v866_v11 }
  0x45   : > { %798 = vmatprep.subr.bf16.mxu1 %v952_v0  ;;  %813 = vmatpush3.bf16.msra.mxu0 %v872_v17 }
  0x46   : > { %814 = vmatprep.subr.bf16.mxu0 %v952_v0 }
  0x48   : > { %799 = vmatpush3.bf16.msra.mxu1 %v867_v12 }
  0x49   : > { %815 = vmatpush3.bf16.msra.mxu0 %v873_v28 }
  0x4a   : > { %816 = vmatprep.subr.bf16.mxu0 %v952_v0 }
  0x4d   : > { %817 = vmatpush3.bf16.msra.mxu0 %v874_v29 }
  0x4e   : > { %818 = vmatprep.subr.bf16.mxu0 %v952_v0 }
  0x51   : > { %819 = vmatpush3.bf16.msra.mxu0 %v875_v30 }
  0xf3   : > { %v381_v19 = vpop.f32.mrf.mxu0 }
  0xf4   : > { %v382_v21 = vadd.f32 %v721_v18, %v381_v19 }
  0xf5   : > { %v782_v20 = vpop.f32.mrf.mxu0 }
  0xf6   : > { %v388_v25 = vmax.f32 %v382_v21, 0.0 }
  0xf7   : > { %v384_v22 = vpop.f32.mrf.mxu0 }
  0xf8   : > { %v385_v23 = vadd.f32 %v721_v18, %v384_v22 }
  0xf9   : > { %v783_v24 = vpop.f32.mrf.mxu0 }
  0xfa   : > { %v389_v26 = vmax.f32 %v385_v23, 0.0 }
  0xfc   : > { %v390_v27 = vpack.c.bf16 %v389_v26, %v388_v25 }
  0xfe   : > { %801 = vmatmul.mubr.bf16.vlgmr.msra.gmra.mxu1 %v390_v27 }
 0x1be   : > { %v496_v32 = vpop.f32.mrf.mxu1 }
 0x1bf   : > { %v497_v34 = vadd.f32 %v726_v31, %v496_v32 }
 0x1c0   : > { %v802_v33 = vpop.f32.mrf.mxu1 }
 0x1c1   : > { %v503_v38 = vmax.f32 %v497_v34, 0.0 }
 0x1c2   : > { %v499_v35 = vpop.f32.mrf.mxu1 }
 0x1c3   : > { %v500_v36 = vadd.f32 %v726_v31, %v499_v35 }
 0x1c4   : > { %v803_v37 = vpop.f32.mrf.mxu1 }
 0x1c5   : > { %v504_v39 = vmax.f32 %v500_v36, 0.0 }
 0x1c7   : > { %v505_v40 = vpack.c.bf16 %v504_v39, %v503_v38 }
 0x1c9   : > { %821 = vmatmul.mubr.bf16.vlgmr.msra.gmra.mxu0 %v505_v40 }
 0x289   : > { %v611_v42 = vpop.f32.mrf.mxu0 }
 0x28a   : > { %v612_v43 = vadd.f32 %v735_v41, %v611_v42 }
 0x28b   : > { %v822_v44 = vpop.f32.mrf.mxu0 }
 0x28c   : > { %876 = vtanh.f32 %v612_v43 }
 0x28d   : > { %v614_v45 = vpop.f32.mrf.mxu0 }
 0x28e   : > { %v615_v46 = vadd.f32 %v735_v41, %v614_v45 }
 0x28f   : > { %v823_v47 = vpop.f32.mrf.mxu0 }
 0x290   : > { %878 = vtanh.f32 %v615_v46 }
 0x299   : > { %v877_v48 = vpop.eup %876 }
 0x29d   : > { %v879_v49 = vpop.eup %878 }
 0x29e   : > { %v753_v50 = vpack.c.bf16 %v879_v49, %v877_v48 }
 0x2a0   : > { %754 = vst [vmem:[%s310_s28] sm:$0xff] %v753_v50  }
 0x2a1 PF: > { %s19_s24 = sadd.s32 1, %s946_s24  }
 0x2a2   : > { %p16_p3 = scmp.ge.s32.totalorder %s19_s24, 4  }
 0x2a4   :  { %18 = sbr.rel (!%p16_p3) target bundleno = 2 (0x2), region = 87 }
 0x2a9   :  { %652 = vsyncpa [#allocation3], 1 }
 0x2aa   :  { %654 = vsyncpa [#allocation3 + $0x1], 1 }
 0x2ab   :  { %655 = vsyncpa [#allocation5], 1 }

</bundles_post_ra>
